<compile_context>
chip_gen: v7x
topology: tpu7x:2x2x1
jax: 0.10.0
libtpu: 0.0.40
codegen_flags: <defaults>
</compile_context>

<pallas_src>
import math

import jax
import jax.numpy as jnp
from jax.experimental import pallas as pl
from jax.experimental.pallas import tpu as pltpu


def _same_pad(k=1, dil=1):
    return math.ceil(dil * (k - 1))


def _round_up(x, m):
    return (x + m - 1) // m * m


def _vmem_budget_bytes():
    """Per-generation usable VMEM budget (physical capacity minus headroom)."""
    cap = 64 * 1024 * 1024
    try:
        cap = int(pltpu.get_tpu_info().vmem_capacity_bytes)
    except Exception:
        pass
    # ~13/16 of physical: ~52 MiB on v7x (64 MiB), ~104 MiB on v5e/v6e
    # (128 MiB); leaves room for Mosaic internal scratch & pipeline buffers.
    return (cap * 13) // 16


# --------------------------------------------------------------------------
# small in-kernel helpers
# --------------------------------------------------------------------------
def _sum_sumsq(v, chunk=256):
    """Per-channel sum and sum-of-squares of a (rows, C) f32 value in one
    traversal: each row chunk is loaded once and feeds both accumulators."""
    rows, c = v.shape
    step = min(chunk, rows)
    s = jnp.zeros((1, c), jnp.float32)
    ss = jnp.zeros((1, c), jnp.float32)
    for i in range(0, rows, step):
        blk = v[i:min(i + step, rows), :]
        s = s + jnp.sum(blk, axis=0, keepdims=True)
        ss = ss + jnp.sum(blk * blk, axis=0, keepdims=True)
    return s, ss


def _mean_var(v, count):
    s, ss = _sum_sumsq(v)
    m = s * (1.0 / count)
    # E[x^2] - m^2 can cancel slightly negative for low-variance channels.
    var = jnp.maximum(ss * (1.0 / count) - m * m, 0.0)
    return m, var


def _row_mask(Lp, L):
    # (Lp, 1) f32 mask: 1.0 for true rows l < L, 0.0 for sublane-pad rows.
    return (jax.lax.broadcasted_iota(jnp.int32, (Lp, 1), 0) < L
            ).astype(jnp.float32)


def _pack_stats(s, ss):
    # Pad the (sum, sumsq) pair to 8 sublane rows so the stats output block
    # is a clean (8, C) tile.
    return jnp.concatenate(
        [s, ss, jnp.zeros((6, s.shape[1]), jnp.float32)], axis=0)


# --------------------------------------------------------------------------
# fused single-shot kernel (whole problem resident in VMEM)
# --------------------------------------------------------------------------
def _make_fused_kernel(N, Lp, L, C2p, Hp, r, eps):
    NL = N * Lp
    count = float(N * L)          # BN divisor: true rows only
    masked = Lp != L

    def kernel(x_ref, vc_ref, vh_ref, w1_ref, w2_ref, w3_ref, out_ref):
        # packed per-channel params (2 DMAs instead of 10 tiny ones)
        g1, be1, b3 = vc_ref[0:1, :], vc_ref[1:2, :], vc_ref[2:3, :]
        b1, g2, be2 = vh_ref[0:1, :], vh_ref[1:2, :], vh_ref[2:3, :]
        b2, g3, be3 = vh_ref[3:4, :], vh_ref[4:5, :], vh_ref[5:6, :]

        rmask = None
        if masked:
            rmask = (jax.lax.broadcasted_iota(jnp.int32, (N, Lp, 1), 1) < L
                     ).astype(jnp.float32).reshape(NL, 1)

        # --- BatchNorm1d(2H) + ReLU (pad rows of x are zero by contract) ---
        x0 = x_ref[...].reshape(NL, C2p)
        m1, v1 = _mean_var(x0, count)
        s1 = g1 * jax.lax.rsqrt(v1 + eps)
        xn = jnp.maximum(x0 * s1 + (be1 - m1 * s1), 0.0)

        # --- conv_1: 1x1, 2H -> H (bf16 operands, f32 accumulation) ---
        h = jnp.dot(xn.astype(jnp.bfloat16), w1_ref[...],
                    preferred_element_type=jnp.float32) + b1
        if masked:
            h = h * rmask                     # zero pad rows before stats

        # --- BatchNorm1d(H) + ReLU ---
        m2, v2 = _mean_var(h, count)
        s2 = g2 * jax.lax.rsqrt(v2 + eps)
        hb = jnp.maximum(h * s2 + (be2 - m2 * s2), 0.0)
        if masked:
            hb = hb * rmask                   # pad rows must be 0 for conv_2
        hb = hb.astype(jnp.bfloat16).reshape(N, Lp, Hp)

        # --- ConstantPad1d((r, r)) + conv_2 (k=3, dilation=r, H -> H) ---
        # taps built directly in bf16; the three tap matmuls are fused into
        # one K = 3*Hp matmul against the pre-packed (3*Hp, Hp) weight.
        z = jnp.zeros((N, r, Hp), jnp.bfloat16)
        tap0 = jnp.concatenate([z, hb[:, :Lp - r, :]], axis=1)   # h[l - r]
        tap2 = jnp.concatenate([hb[:, r:, :], z], axis=1)        # h[l + r]
        taps = jnp.concatenate([tap0, hb, tap2], axis=-1).reshape(NL, 3 * Hp)
        g = jnp.dot(taps, w2_ref[...],
                    preferred_element_type=jnp.float32) + b2
        if masked:
            g = g * rmask

        # --- BatchNorm1d(H) + ReLU ---
        m3, v3 = _mean_var(g, count)
        s3 = g3 * jax.lax.rsqrt(v3 + eps)
        gn = jnp.maximum(g * s3 + (be3 - m3 * s3), 0.0)

        # --- conv_3: 1x1, H -> 2H, then residual add ---
        o = jnp.dot(gn.astype(jnp.bfloat16), w3_ref[...],
                    preferred_element_type=jnp.float32) + b3
        o = o + x0
        if masked:
            o = o * rmask                     # keep pad rows zero for chaining
        out_ref[...] = o.reshape(N, Lp, C2p)

    return kernel


# --------------------------------------------------------------------------
# gridded two-phase-BN stage kernels (grid over the batch axis)
# --------------------------------------------------------------------------
def _stats_kernel(x_ref, st_ref):
    s, ss = _sum_sumsq(x_ref[0])
    st_ref[0] = _pack_stats(s, ss)


def _make_conv1_kernel(Lp, L):
    masked = Lp != L

    def kernel(x_ref, aff1_ref, b1_ref, w1_ref, h_ref, st_ref):
        xn = jnp.maximum(x_ref[0] * aff1_ref[0:1, :] + aff1_ref[1:2, :], 0.0)
        h = jnp.dot(xn.astype(jnp.bfloat16), w1_ref[...],
                    preferred_element_type=jnp.float32) + b1_ref[...]
        if masked:
            h = h * _row_mask(Lp, L)
        s, ss = _sum_sumsq(h)
        h_ref[0] = h
        st_ref[0] = _pack_stats(s, ss)

    return kernel


def _make_conv2_kernel(Lp, L, Hp, r):
    masked = Lp != L

    def kernel(h_ref, aff2_ref, b2_ref, w2_ref, g_ref, st_ref):
        hn = jnp.maximum(h_ref[0] * aff2_ref[0:1, :] + aff2_ref[1:2, :], 0.0)
        rm = _row_mask(Lp, L) if masked else None
        if masked:
            hn = hn * rm                      # PyTorch pads with zeros
        hb = hn.astype(jnp.bfloat16)
        z = jnp.zeros((r, Hp), jnp.bfloat16)
        tap0 = jnp.concatenate([z, hb[:Lp - r, :]], axis=0)      # h[l - r]
        tap2 = jnp.concatenate([hb[r:, :], z], axis=0)           # h[l + r]
        taps = jnp.concatenate([tap0, hb, tap2], axis=-1)        # (Lp, 3Hp)
        g = jnp.dot(taps, w2_ref[...],
                    preferred_element_type=jnp.float32) + b2_ref[...]
        if masked:
            g = g * rm
        s, ss = _sum_sumsq(g)
        g_ref[0] = g
        st_ref[0] = _pack_stats(s, ss)

    return kernel


def _make_conv3_kernel(Lp, L):
    masked = Lp != L

    def kernel(g_ref, x_ref, aff3_ref, b3_ref, w3_ref, o_ref):
        gn = jnp.maximum(g_ref[0] * aff3_ref[0:1, :] + aff3_ref[1:2, :], 0.0)
        o = (jnp.dot(gn.astype(jnp.bfloat16), w3_ref[...],
                     preferred_element_type=jnp.float32)
             + b3_ref[...] + x_ref[0])
        if masked:
            o = o * _row_mask(Lp, L)          # keep pad rows zero for chaining
        o_ref[0] = o

    return kernel


# --------------------------------------------------------------------------
# parameter packing (done once per model, reused by every block invocation)
# --------------------------------------------------------------------------
def pack_bytenet_params(params, *, hidden_size):
    H = hidden_size
    C2 = 2 * H
    C2p = _round_up(C2, 128)
    Hp = _round_up(H, 128)

    def padv(v, n):
        return jnp.pad(v.astype(jnp.float32), (0, n - v.shape[0]))

    def padm(w, rn, cn):
        w = jnp.pad(w.astype(jnp.float32),
                    ((0, rn - w.shape[0]), (0, cn - w.shape[1])))
        return w.astype(jnp.bfloat16)

    return {
        "C2": C2, "C2p": C2p, "H": H, "Hp": Hp,
        "w1": padm(params["w1"], C2p, Hp),                       # (C2p, Hp)
        "w2": jnp.concatenate([padm(params["w2"][k], Hp, Hp)
                               for k in range(3)], axis=0),      # (3Hp, Hp)
        "w3": padm(params["w3"], Hp, C2p),                       # (Hp, C2p)
        # per-channel vectors packed into two arrays (fewer tiny DMAs)
        "vecC": jnp.stack([padv(params["bn1_g"], C2p),
                           padv(params["bn1_b"], C2p),
                           padv(params["b3"], C2p)]),            # (3, C2p)
        "vecH": jnp.stack([padv(params["b1"], Hp),
                           padv(params["bn2_g"], Hp),
                           padv(params["bn2_b"], Hp),
                           padv(params["b2"], Hp),
                           padv(params["bn3_g"], Hp),
                           padv(params["bn3_b"], Hp)]),          # (6, Hp)
    }


# --------------------------------------------------------------------------
# resident-layout entry point: (N, Lp, C2p) padded channels-last in and out
# --------------------------------------------------------------------------
def bytenet_block_pallas_nlc(x_pad, packed, *, L, r, eps, force_grid=False):
    """x_pad: (N, Lp, C2p) f32, channel cols >= 2H and rows >= L are zero.
    Returns the block output in the same padded layout (pads again zero)."""
    N, Lp, C2p = x_pad.shape
    Hp = packed["Hp"]
    assert C2p == packed["C2p"] and Lp % 8 == 0 and L <= Lp
    assert 0 < r < L, "kernel assumes dilation < sequence length"

    budget = _vmem_budget_bytes()
    vC, vH = packed["vecC"], packed["vecH"]
    w1, w2, w3 = packed["w1"], packed["w2"], packed["w3"]

    # rough fused-path working-set estimate (f32 acts + bf16 taps + weights)
    rows = N * Lp
    fused_need = (4 * rows * (2 * C2p + 3 * Hp)
                  + 2 * rows * 4 * Hp
                  + 2 * (C2p * Hp + 3 * Hp * Hp + Hp * C2p))
    fused_need = fused_need * 3 // 2          # temporaries headroom

    if not force_grid and fused_need <= budget:
        kernel = _make_fused_kernel(N, Lp, L, C2p, Hp, r, eps)
        return pl.pallas_call(
            kernel,
            out_shape=jax.ShapeDtypeStruct((N, Lp, C2p), jnp.float32),
            in_specs=[pl.BlockSpec(memory_space=pltpu.MemorySpace.VMEM)] * 6,
            out_specs=pl.BlockSpec(memory_space=pltpu.MemorySpace.VMEM),
            compiler_params=pltpu.CompilerParams(vmem_limit_bytes=budget),
        )(x_pad, vC, vH, w1, w2, w3)

    # ------------------- gridded two-phase-BN path -------------------------
    count = float(N * L)
    cparams = pltpu.CompilerParams(dimension_semantics=("parallel",),
                                   vmem_limit_bytes=budget)

    def batch_spec(c):
        return pl.BlockSpec((1, Lp, c), lambda n: (n, 0, 0))

    def stat_spec(c):
        return pl.BlockSpec((1, 8, c), lambda n: (n, 0, 0))

    def const_spec(shape):
        return pl.BlockSpec(shape, lambda n: (0,) * len(shape))

    def affine(stats, gamma, beta):
        # finalize partial stats -> per-channel (scale, shift), clamped var
        s = jnp.sum(stats[:, 0, :], axis=0)
        ss = jnp.sum(stats[:, 1, :], axis=0)
        m = s / count
        var = jnp.maximum(ss / count - m * m, 0.0)
        scale = gamma * jax.lax.rsqrt(var + eps)
        return jnp.stack([scale, beta - m * scale], axis=0)      # (2, C)

    # A) partial per-channel stats of x
    st_x = pl.pallas_call(
        _stats_kernel,
        grid=(N,),
        out_shape=jax.ShapeDtypeStruct((N, 8, C2p), jnp.float32),
        in_specs=[batch_spec(C2p)],
        out_specs=stat_spec(C2p),
        compiler_params=cparams,
    )(x_pad)
    aff1 = affine(st_x, vC[0], vC[1])

    # B) BN1 + ReLU + conv_1 -> h (+ partial stats of h)
    h, st_h = pl.pallas_call(
        _make_conv1_kernel(Lp, L),
        grid=(N,),
        out_shape=(jax.ShapeDtypeStruct((N, Lp, Hp), jnp.float32),
                   jax.ShapeDtypeStruct((N, 8, Hp), jnp.float32)),
        in_specs=[batch_spec(C2p), const_spec((2, C2p)),
                  const_spec((1, Hp)), const_spec((C2p, Hp))],
        out_specs=(batch_spec(Hp), stat_spec(Hp)),
        compiler_params=cparams,
    )(x_pad, aff1, vH[0:1], w1)
    aff2 = affine(st_h, vH[1], vH[2])

    # C) BN2 + ReLU + pad + dilated conv_2 -> g (+ partial stats of g)
    g, st_g = pl.pallas_call(
        _make_conv2_kernel(Lp, L, Hp, r),
        grid=(N,),
        out_shape=(jax.ShapeDtypeStruct((N, Lp, Hp), jnp.float32),
                   jax.ShapeDtypeStruct((N, 8, Hp), jnp.float32)),
        in_specs=[batch_spec(Hp), const_spec((2, Hp)),
                  const_spec((1, Hp)), const_spec((3 * Hp, Hp))],
        out_specs=(batch_spec(Hp), stat_spec(Hp)),
        compiler_params=cparams,
    )(h, aff2, vH[3:4], w2)
    aff3 = affine(st_g, vH[4], vH[5])

    # D) BN3 + ReLU + conv_3 + residual -> out
    out = pl.pallas_call(
        _make_conv3_kernel(Lp, L),
        grid=(N,),
        out_shape=jax.ShapeDtypeStruct((N, Lp, C2p), jnp.float32),
        in_specs=[batch_spec(Hp), batch_spec(C2p), const_spec((2, Hp)),
                  const_spec((1, C2p)), const_spec((Hp, C2p))],
        out_specs=batch_spec(C2p),
        compiler_params=cparams,
    )(g, x_pad, aff3, vC[2:3], w3)
    return out


# --------------------------------------------------------------------------
# drop-in NCL wrapper (one boundary transpose/pad per call)
# --------------------------------------------------------------------------
def bytenet_block_pallas(x_ncl, params, r, eps, force_grid=False):
    """x_ncl: (N, 2H, L) float32, same as the PyTorch module input.  For a
    stack of blocks, pack params once and call bytenet_block_pallas_nlc so
    the NCL<->NLC transpose + pad HBM round trips happen once per model."""
    N, C2, L = x_ncl.shape
    H = C2 // 2
    packed = pack_bytenet_params(params, hidden_size=H)
    C2p, Lp = packed["C2p"], _round_up(L, 8)

    x = jnp.transpose(x_ncl, (0, 2, 1)).astype(jnp.float32)
    x = jnp.pad(x, ((0, 0), (0, Lp - L), (0, C2p - C2)))
    out = bytenet_block_pallas_nlc(x, packed, L=L, r=r, eps=eps,
                                   force_grid=force_grid)
    return jnp.transpose(out[:, :L, :C2], (0, 2, 1))


# --------------------------------------------------------------------------
# pure-JAX reference mirroring the PyTorch forward (f32 throughout)
# --------------------------------------------------------------------------
def bytenet_block_reference(x_ncl, params, r, eps):
    x = jnp.transpose(x_ncl, (0, 2, 1)).astype(jnp.float32)
    L = x.shape[1]
    p = _same_pad(3, r)
    pad_l, pad_r = ((p // 2 + 1, p // 2) if p % 2 == 1 else (p // 2, p // 2))

    def bn(v, g, b):
        m = jnp.mean(v, axis=(0, 1), keepdims=True)
        var = jnp.mean((v - m) ** 2, axis=(0, 1), keepdims=True)
        return (v - m) * jax.lax.rsqrt(var + eps) * g + b

    h = jnp.maximum(bn(x, params["bn1_g"], params["bn1_b"]), 0.0)
    h = jnp.einsum("nlc,ch->nlh", h, params["w1"]) + params["b1"]
    h = jnp.maximum(bn(h, params["bn2_g"], params["bn2_b"]), 0.0)
    hp = jnp.pad(h, ((0, 0), (pad_l, pad_r), (0, 0)))
    g = params["b2"] + sum(
        jnp.einsum("nlh,hg->nlg", hp[:, k * r:k * r + L, :], params["w2"][k])
        for k in range(3))
    g = jnp.maximum(bn(g, params["bn3_g"], params["bn3_b"]), 0.0)
    o = jnp.einsum("nlh,hc->nlc", g, params["w3"]) + params["b3"]
    return jnp.transpose(o + x, (0, 2, 1))


def _make_params(key, hidden):
    C2 = 2 * hidden
    ks = jax.random.split(key, 12)
    s = 0.1
    return {
        "bn1_g": 1.0 + s * jax.random.normal(ks[0], (C2,), jnp.float32),
        "bn1_b": s * jax.random.normal(ks[1], (C2,), jnp.float32),
        # conv_1 weight (H, 2H, 1) stored transposed as (2H, H)
        "w1": s * jax.random.normal(ks[2], (C2, hidden), jnp.float32),
        "b1": s * jax.random.normal(ks[3], (hidden,), jnp.float32),
        "bn2_g": 1.0 + s * jax.random.normal(ks[4], (hidden,), jnp.float32),
        "bn2_b": s * jax.random.normal(ks[5], (hidden,), jnp.float32),
        # conv_2 weight (H, H, 3) stored per-tap transposed as (3, H_in, H_out)
        "w2": s * jax.random.normal(ks[6], (3, hidden, hidden), jnp.float32),
        "b2": s * jax.random.normal(ks[7], (hidden,), jnp.float32),
        "bn3_g": 1.0 + s * jax.random.normal(ks[8], (hidden,), jnp.float32),
        "bn3_b": s * jax.random.normal(ks[9], (hidden,), jnp.float32),
        # conv_3 weight (2H, H, 1) stored transposed as (H, 2H)
        "w3": s * jax.random.normal(ks[10], (hidden, C2), jnp.float32),
        "b3": s * jax.random.normal(ks[11], (C2,), jnp.float32),
    }


if __name__ == "__main__":
    eps = 1e-5                               # args.layer_norm_eps
    key = jax.random.PRNGKey(0)
    kp, kx1, kx2 = jax.random.split(key, 3)

    # config 1: hidden=32 (2H=64 channels), N=2, L=16 (multiple of 8), r=2
    hidden, N, L, r = 32, 2, 16, 2
    params = _make_params(kp, hidden)
    x = jax.random.normal(kx1, (N, 2 * hidden, L), jnp.float32)
    ref = bytenet_block_reference(x, params, r, eps)
    for force_grid in (False, True):         # exercise fused AND gridded paths
        out = jax.block_until_ready(
            bytenet_block_pallas(x, params, r, eps, force_grid=force_grid))
        assert out.shape == (N, 2 * hidden, L)
        assert jnp.allclose(out, ref, rtol=3e-2, atol=3e-2), (
            f"kernel/reference mismatch (force_grid={force_grid})")

    # config 2: L=13 (not a multiple of 8) exercises pad-row masking, r=3
    hidden, N, L, r = 32, 2, 13, 3
    params = _make_params(kp, hidden)
    x = jax.random.normal(kx2, (N, 2 * hidden, L), jnp.float32)
    ref = bytenet_block_reference(x, params, r, eps)
    for force_grid in (False, True):
        out = jax.block_until_ready(
            bytenet_block_pallas(x, params, r, eps, force_grid=force_grid))
        assert out.shape == (N, 2 * hidden, L)
        assert jnp.allclose(out, ref, rtol=3e-2, atol=3e-2), (
            f"kernel/reference mismatch (L=13, force_grid={force_grid})")

    print("KERNEL_OK")
</pallas_src>

<mosaic_0001>
module attributes {stable_mosaic.version = 11 : i64} {
  func.func @kernel(%arg0: memref<2x16x128xf32, #tpu.memory_space<vmem>>, %arg1: memref<3x128xf32, #tpu.memory_space<vmem>>, %arg2: memref<6x128xf32, #tpu.memory_space<vmem>>, %arg3: memref<128x128xbf16, #tpu.memory_space<vmem>>, %arg4: memref<384x128xbf16, #tpu.memory_space<vmem>>, %arg5: memref<128x128xbf16, #tpu.memory_space<vmem>>, %arg6: memref<2x16x128xf32, #tpu.memory_space<vmem>>) attributes {dimension_semantics = [], scalar_prefetch = 0 : i64, scratch_operands = 0 : i64, tpu.core_type = #tpu.core_type<tc>} {
    %c0 = arith.constant 0 : index
    %c0_0 = arith.constant 0 : index
    %0 = vector.load %arg1[%c0, %c0_0] : memref<3x128xf32, #tpu.memory_space<vmem>>, vector<1x128xf32>
    %c1 = arith.constant 1 : index
    %c0_1 = arith.constant 0 : index
    %1 = vector.load %arg1[%c1, %c0_1] : memref<3x128xf32, #tpu.memory_space<vmem>>, vector<1x128xf32>
    %c2 = arith.constant 2 : index
    %c0_2 = arith.constant 0 : index
    %2 = vector.load %arg1[%c2, %c0_2] : memref<3x128xf32, #tpu.memory_space<vmem>>, vector<1x128xf32>
    %c0_3 = arith.constant 0 : index
    %c0_4 = arith.constant 0 : index
    %3 = vector.load %arg2[%c0_3, %c0_4] : memref<6x128xf32, #tpu.memory_space<vmem>>, vector<1x128xf32>
    %c1_5 = arith.constant 1 : index
    %c0_6 = arith.constant 0 : index
    %4 = vector.load %arg2[%c1_5, %c0_6] : memref<6x128xf32, #tpu.memory_space<vmem>>, vector<1x128xf32>
    %c2_7 = arith.constant 2 : index
    %c0_8 = arith.constant 0 : index
    %5 = vector.load %arg2[%c2_7, %c0_8] : memref<6x128xf32, #tpu.memory_space<vmem>>, vector<1x128xf32>
    %c3 = arith.constant 3 : index
    %c0_9 = arith.constant 0 : index
    %6 = vector.load %arg2[%c3, %c0_9] : memref<6x128xf32, #tpu.memory_space<vmem>>, vector<1x128xf32>
    %c4 = arith.constant 4 : index
    %c0_10 = arith.constant 0 : index
    %7 = vector.load %arg2[%c4, %c0_10] : memref<6x128xf32, #tpu.memory_space<vmem>>, vector<1x128xf32>
    %c5 = arith.constant 5 : index
    %c0_11 = arith.constant 0 : index
    %8 = vector.load %arg2[%c5, %c0_11] : memref<6x128xf32, #tpu.memory_space<vmem>>, vector<1x128xf32>
    %c0_12 = arith.constant 0 : index
    %c0_13 = arith.constant 0 : index
    %c0_14 = arith.constant 0 : index
    %9 = vector.load %arg0[%c0_12, %c0_13, %c0_14] : memref<2x16x128xf32, #tpu.memory_space<vmem>>, vector<2x16x128xf32>
    %10 = vector.shape_cast %9 : vector<2x16x128xf32> to vector<32x128xf32>
    %cst = arith.constant 0.000000e+00 : f32
    %11 = vector.broadcast %cst : f32 to vector<1x128xf32>
    %cst_15 = arith.constant 0.000000e+00 : f32
    %12 = vector.broadcast %cst_15 : f32 to vector<1x128xf32>
    %cst_16 = arith.constant dense<0.000000e+00> : vector<128xf32>
    %13 = vector.multi_reduction <add>, %10, %cst_16 [0] : vector<32x128xf32> to vector<128xf32>
    %14 = vector.shape_cast %13 : vector<128xf32> to vector<1x128xf32>
    %15 = arith.addf %11, %14 : vector<1x128xf32>
    %16 = arith.mulf %10, %10 : vector<32x128xf32>
    %cst_17 = arith.constant dense<0.000000e+00> : vector<128xf32>
    %17 = vector.multi_reduction <add>, %16, %cst_17 [0] : vector<32x128xf32> to vector<128xf32>
    %18 = vector.shape_cast %17 : vector<128xf32> to vector<1x128xf32>
    %19 = arith.addf %12, %18 : vector<1x128xf32>
    %cst_18 = arith.constant 3.125000e-02 : f32
    %20 = vector.broadcast %cst_18 : f32 to vector<1x128xf32>
    %21 = arith.mulf %15, %20 : vector<1x128xf32>
    %cst_19 = arith.constant 3.125000e-02 : f32
    %22 = vector.broadcast %cst_19 : f32 to vector<1x128xf32>
    %23 = arith.mulf %19, %22 : vector<1x128xf32>
    %24 = arith.mulf %21, %21 : vector<1x128xf32>
    %25 = arith.subf %23, %24 : vector<1x128xf32>
    %cst_20 = arith.constant 0.000000e+00 : f32
    %26 = vector.broadcast %cst_20 : f32 to vector<1x128xf32>
    %27 = arith.maximumf %25, %26 : vector<1x128xf32>
    %cst_21 = arith.constant 9.99999974E-6 : f32
    %28 = vector.broadcast %cst_21 : f32 to vector<1x128xf32>
    %29 = arith.addf %27, %28 : vector<1x128xf32>
    %30 = math.rsqrt %29 : vector<1x128xf32>
    %31 = arith.mulf %0, %30 : vector<1x128xf32>
    %32 = vector.broadcast %31 : vector<1x128xf32> to vector<32x128xf32>
    %33 = arith.mulf %10, %32 : vector<32x128xf32>
    %34 = arith.mulf %21, %31 : vector<1x128xf32>
    %35 = arith.subf %1, %34 : vector<1x128xf32>
    %36 = vector.broadcast %35 : vector<1x128xf32> to vector<32x128xf32>
    %37 = arith.addf %33, %36 : vector<32x128xf32>
    %cst_22 = arith.constant 0.000000e+00 : f32
    %38 = vector.broadcast %cst_22 : f32 to vector<32x128xf32>
    %39 = arith.maximumf %37, %38 : vector<32x128xf32>
    %40 = arith.truncf %39 : vector<32x128xf32> to vector<32x128xbf16>
    %c0_23 = arith.constant 0 : index
    %c0_24 = arith.constant 0 : index
    %41 = vector.load %arg3[%c0_23, %c0_24] : memref<128x128xbf16, #tpu.memory_space<vmem>>, vector<128x128xbf16>
    %cst_25 = arith.constant dense<0.000000e+00> : vector<32x128xf32>
    %42 = tpu.matmul %40, %41, %cst_25 {dimension_numbers = #tpu.dot_dimension_numbers<[1], [0], [0], [1], [0, 0, 1, 1], [], []>} : vector<32x128xbf16>, vector<128x128xbf16>, vector<32x128xf32> -> vector<32x128xf32>
    %43 = vector.broadcast %3 : vector<1x128xf32> to vector<32x128xf32>
    %44 = arith.addf %42, %43 : vector<32x128xf32>
    %cst_26 = arith.constant 0.000000e+00 : f32
    %45 = vector.broadcast %cst_26 : f32 to vector<1x128xf32>
    %cst_27 = arith.constant 0.000000e+00 : f32
    %46 = vector.broadcast %cst_27 : f32 to vector<1x128xf32>
    %cst_28 = arith.constant dense<0.000000e+00> : vector<128xf32>
    %47 = vector.multi_reduction <add>, %44, %cst_28 [0] : vector<32x128xf32> to vector<128xf32>
    %48 = vector.shape_cast %47 : vector<128xf32> to vector<1x128xf32>
    %49 = arith.addf %45, %48 : vector<1x128xf32>
    %50 = arith.mulf %44, %44 : vector<32x128xf32>
    %cst_29 = arith.constant dense<0.000000e+00> : vector<128xf32>
    %51 = vector.multi_reduction <add>, %50, %cst_29 [0] : vector<32x128xf32> to vector<128xf32>
    %52 = vector.shape_cast %51 : vector<128xf32> to vector<1x128xf32>
    %53 = arith.addf %46, %52 : vector<1x128xf32>
    %cst_30 = arith.constant 3.125000e-02 : f32
    %54 = vector.broadcast %cst_30 : f32 to vector<1x128xf32>
    %55 = arith.mulf %49, %54 : vector<1x128xf32>
    %cst_31 = arith.constant 3.125000e-02 : f32
    %56 = vector.broadcast %cst_31 : f32 to vector<1x128xf32>
    %57 = arith.mulf %53, %56 : vector<1x128xf32>
    %58 = arith.mulf %55, %55 : vector<1x128xf32>
    %59 = arith.subf %57, %58 : vector<1x128xf32>
    %cst_32 = arith.constant 0.000000e+00 : f32
    %60 = vector.broadcast %cst_32 : f32 to vector<1x128xf32>
    %61 = arith.maximumf %59, %60 : vector<1x128xf32>
    %cst_33 = arith.constant 9.99999974E-6 : f32
    %62 = vector.broadcast %cst_33 : f32 to vector<1x128xf32>
    %63 = arith.addf %61, %62 : vector<1x128xf32>
    %64 = math.rsqrt %63 : vector<1x128xf32>
    %65 = arith.mulf %4, %64 : vector<1x128xf32>
    %66 = vector.broadcast %65 : vector<1x128xf32> to vector<32x128xf32>
    %67 = arith.mulf %44, %66 : vector<32x128xf32>
    %68 = arith.mulf %55, %65 : vector<1x128xf32>
    %69 = arith.subf %5, %68 : vector<1x128xf32>
    %70 = vector.broadcast %69 : vector<1x128xf32> to vector<32x128xf32>
    %71 = arith.addf %67, %70 : vector<32x128xf32>
    %cst_34 = arith.constant 0.000000e+00 : f32
    %72 = vector.broadcast %cst_34 : f32 to vector<32x128xf32>
    %73 = arith.maximumf %71, %72 : vector<32x128xf32>
    %74 = arith.truncf %73 : vector<32x128xf32> to vector<32x128xbf16>
    %75 = vector.shape_cast %74 : vector<32x128xbf16> to vector<2x16x128xbf16>
    %cst_35 = arith.constant 0.000000e+00 : bf16
    %76 = vector.broadcast %cst_35 : bf16 to vector<2x2x128xbf16>
    %77 = vector.extract_strided_slice %75 {offsets = [0, 0, 0], sizes = [2, 14, 128], strides = [1, 1, 1]} : vector<2x16x128xbf16> to vector<2x14x128xbf16>
    %78 = tpu.concatenate %76, %77 in 1 : vector<2x2x128xbf16>, vector<2x14x128xbf16> -> vector<2x16x128xbf16>
    %79 = vector.extract_strided_slice %75 {offsets = [0, 2, 0], sizes = [2, 14, 128], strides = [1, 1, 1]} : vector<2x16x128xbf16> to vector<2x14x128xbf16>
    %80 = tpu.concatenate %79, %76 in 1 : vector<2x14x128xbf16>, vector<2x2x128xbf16> -> vector<2x16x128xbf16>
    %81 = tpu.concatenate %78, %75, %80 in 2 : vector<2x16x128xbf16>, vector<2x16x128xbf16>, vector<2x16x128xbf16> -> vector<2x16x384xbf16>
    %82 = vector.shape_cast %81 : vector<2x16x384xbf16> to vector<32x384xbf16>
    %c0_36 = arith.constant 0 : index
    %c0_37 = arith.constant 0 : index
    %83 = vector.load %arg4[%c0_36, %c0_37] : memref<384x128xbf16, #tpu.memory_space<vmem>>, vector<384x128xbf16>
    %cst_38 = arith.constant dense<0.000000e+00> : vector<32x128xf32>
    %84 = tpu.matmul %82, %83, %cst_38 {dimension_numbers = #tpu.dot_dimension_numbers<[1], [0], [0], [1], [0, 0, 1, 1], [], []>} : vector<32x384xbf16>, vector<384x128xbf16>, vector<32x128xf32> -> vector<32x128xf32>
    %85 = vector.broadcast %6 : vector<1x128xf32> to vector<32x128xf32>
    %86 = arith.addf %84, %85 : vector<32x128xf32>
    %cst_39 = arith.constant 0.000000e+00 : f32
    %87 = vector.broadcast %cst_39 : f32 to vector<1x128xf32>
    %cst_40 = arith.constant 0.000000e+00 : f32
    %88 = vector.broadcast %cst_40 : f32 to vector<1x128xf32>
    %cst_41 = arith.constant dense<0.000000e+00> : vector<128xf32>
    %89 = vector.multi_reduction <add>, %86, %cst_41 [0] : vector<32x128xf32> to vector<128xf32>
    %90 = vector.shape_cast %89 : vector<128xf32> to vector<1x128xf32>
    %91 = arith.addf %87, %90 : vector<1x128xf32>
    %92 = arith.mulf %86, %86 : vector<32x128xf32>
    %cst_42 = arith.constant dense<0.000000e+00> : vector<128xf32>
    %93 = vector.multi_reduction <add>, %92, %cst_42 [0] : vector<32x128xf32> to vector<128xf32>
    %94 = vector.shape_cast %93 : vector<128xf32> to vector<1x128xf32>
    %95 = arith.addf %88, %94 : vector<1x128xf32>
    %cst_43 = arith.constant 3.125000e-02 : f32
    %96 = vector.broadcast %cst_43 : f32 to vector<1x128xf32>
    %97 = arith.mulf %91, %96 : vector<1x128xf32>
    %cst_44 = arith.constant 3.125000e-02 : f32
    %98 = vector.broadcast %cst_44 : f32 to vector<1x128xf32>
    %99 = arith.mulf %95, %98 : vector<1x128xf32>
    %100 = arith.mulf %97, %97 : vector<1x128xf32>
    %101 = arith.subf %99, %100 : vector<1x128xf32>
    %cst_45 = arith.constant 0.000000e+00 : f32
    %102 = vector.broadcast %cst_45 : f32 to vector<1x128xf32>
    %103 = arith.maximumf %101, %102 : vector<1x128xf32>
    %cst_46 = arith.constant 9.99999974E-6 : f32
    %104 = vector.broadcast %cst_46 : f32 to vector<1x128xf32>
    %105 = arith.addf %103, %104 : vector<1x128xf32>
    %106 = math.rsqrt %105 : vector<1x128xf32>
    %107 = arith.mulf %7, %106 : vector<1x128xf32>
    %108 = vector.broadcast %107 : vector<1x128xf32> to vector<32x128xf32>
    %109 = arith.mulf %86, %108 : vector<32x128xf32>
    %110 = arith.mulf %97, %107 : vector<1x128xf32>
    %111 = arith.subf %8, %110 : vector<1x128xf32>
    %112 = vector.broadcast %111 : vector<1x128xf32> to vector<32x128xf32>
    %113 = arith.addf %109, %112 : vector<32x128xf32>
    %cst_47 = arith.constant 0.000000e+00 : f32
    %114 = vector.broadcast %cst_47 : f32 to vector<32x128xf32>
    %115 = arith.maximumf %113, %114 : vector<32x128xf32>
    %116 = arith.truncf %115 : vector<32x128xf32> to vector<32x128xbf16>
    %c0_48 = arith.constant 0 : index
    %c0_49 = arith.constant 0 : index
    %117 = vector.load %arg5[%c0_48, %c0_49] : memref<128x128xbf16, #tpu.memory_space<vmem>>, vector<128x128xbf16>
    %cst_50 = arith.constant dense<0.000000e+00> : vector<32x128xf32>
    %118 = tpu.matmul %116, %117, %cst_50 {dimension_numbers = #tpu.dot_dimension_numbers<[1], [0], [0], [1], [0, 0, 1, 1], [], []>} : vector<32x128xbf16>, vector<128x128xbf16>, vector<32x128xf32> -> vector<32x128xf32>
    %119 = vector.broadcast %2 : vector<1x128xf32> to vector<32x128xf32>
    %120 = arith.addf %118, %119 : vector<32x128xf32>
    %121 = arith.addf %120, %10 : vector<32x128xf32>
    %122 = vector.shape_cast %121 : vector<32x128xf32> to vector<2x16x128xf32>
    %c0_51 = arith.constant 0 : index
    %c0_52 = arith.constant 0 : index
    %c0_53 = arith.constant 0 : index
    %123 = vector.load %arg6[%c0_51, %c0_52, %c0_53] : memref<2x16x128xf32, #tpu.memory_space<vmem>>, vector<2x16x128xf32>
    tpu.vector_store %arg6[%c0_51, %c0_52, %c0_53], %122 {strides = array<i32>} : memref<2x16x128xf32, #tpu.memory_space<vmem>>, vector<2x16x128xf32>,
    return
  }
}

</mosaic_0001>

<bundles_post_ra>
// kernel: tpu_custom_call.1
= control target key start
LH: loop header
LB: loop body
LE: loop exit
PB: predicated region body
PF: predicated region fallthrough
CT: control target
= control target key end

     0   :  { %11 = vsyncpa [#allocation3], 0  ;;  %s1437_s0 = inlined_call_operand.hbm [shape: f32[2,16,128], index: 0, kind: input, shape index: {}]   ;;  %s1438_s1 = inlined_call_operand.hbm [shape: f32[3,128], index: 1, kind: input, shape index: {}]   ;;  %s1439_s2 = inlined_call_operand.hbm [shape: f32[6,128], index: 2, kind: input, shape index: {}]   ;;  %s1440_s3 = inlined_call_operand.hbm [shape: bf16[128,128], index: 3, kind: input, shape index: {}]   ;;  %s1441_s4 = inlined_call_operand.hbm [shape: bf16[384,128], index: 4, kind: input, shape index: {}]   ;;  %s1442_s5 = inlined_call_operand.hbm [shape: bf16[128,128], index: 5, kind: input, shape index: {}]   ;;  %s1443_s6 = inlined_call_operand.hbm [shape: f32[2,16,128], index: 6, kind: output, shape index: {}]  }
   0x1   :  { %12 = vsyncpa [#allocation6], 0 }
   0x2   :  { %13 = vsyncpa [#allocation9], 0 }
   0x3   :  { %14 = vsyncpa [#allocation12], 0 }
   0x4   :  { %15 = vsyncpa [#allocation4], 0  ;;  %s1249_s21 = smov [#allocation5]   ;;  %s1250_s23 = smov [#allocation8]  }
   0x5   :  { %s34_s22 = sshll.u32 %s1249_s21, 4  ;;  %s53_s24 = sshll.u32 %s1250_s23, 4  ;;  %s35_s22 = int_to_ptr.vmem [resolvable:$true] %s34_s22  ;;  %s1295_s24 = int_to_ptr.vmem [resolvable:$true] %s53_s24 }
   0x6   :  { %s1085_s27 = scalar_lea.hbm %s1438_s1, 64 }
   0x7   :  { %p1086_p0 = scmp.ne.s32.totalorder %s1438_s1, %s1085_s27  ;;  %p1089_p1 = scmp.lt.u32.totalorder %s1085_s27, %s1438_s1 }
   0x9   :  { %p1091_p2 = pnand %p1089_p1, %p1086_p0 }
   0xb   :  { %1094 = shalt.err (!%p1091_p2)
}
   0xc   :  { %s1095_s8 = scalar_lea.vmem %s35_s22, 64  ;;  %p1100_p4 = scmp.lt.s32.totalorder %s35_s22, %s35_s22 }
   0xd   :  { %p1096_p3 = scmp.ne.s32.totalorder %s35_s22, %s1095_s8  ;;  %p1101_p5 = scmp.lt.s32.totalorder %s1095_s8, %s1095_s8 }
   0xf   :  { %p1102_p6 = por %p1101_p5, %p1100_p4 }
  0x11   :  { %p1103_p7 = pnand %p1102_p6, %p1096_p3 }
  0x13   :  { %1106 = shalt.err (!%p1103_p7)
}
  0x14   :  { %37 = dma.hbm_to_vmem [thread:$0]  %s1438_s1, 64, %s35_s22, [#allocation6]  }
  0x15   :  { %s1107_s13 = scalar_lea.hbm %s1440_s3, 1024 }
  0x16   :  { %p1108_p8 = scmp.ne.s32.totalorder %s1440_s3, %s1107_s13  ;;  %p1111_p9 = scmp.lt.u32.totalorder %s1107_s13, %s1440_s3 }
  0x18   :  { %p1113_p10 = pnand %p1111_p9, %p1108_p8 }
  0x1a   :  { %1116 = shalt.err (!%p1113_p10)
}
  0x1b   :  { %s1117_s18 = scalar_lea.vmem %s1295_s24, 1024  ;;  %p1122_p12 = scmp.lt.s32.totalorder %s1295_s24, %s1295_s24 }
  0x1c   :  { %p1118_p11 = scmp.ne.s32.totalorder %s1295_s24, %s1117_s18  ;;  %p1123_p13 = scmp.lt.s32.totalorder %s1117_s18, %s1117_s18 }
  0x1e   :  { %p1124_p0 = por %p1123_p13, %p1122_p12 }
  0x20   :  { %p1125_p1 = pnand %p1124_p0, %p1118_p11 }
  0x22   :  { %1128 = shalt.err (!%p1125_p1)
}
  0x23   :  { %s1251_s1 = smov 64   ;;  %s1252_s19 = smov 4  }
  0x24   :  { %59 = dma.hbm_to_vmem [thread:$0]  %s1440_s3, 1024, %s1295_s24, [#allocation9], %s1251_s1, %s1251_s1, %s1252_s19  }
  0x25   :  { %s1253_s22 = smov [#allocation2]   ;;  %s1129_s27 = scalar_lea.hbm %s1437_s0, 512 }
  0x26   :  { %s21_s23 = sshll.u32 %s1253_s22, 4  ;;  %p1130_p2 = scmp.ne.s32.totalorder %s1437_s0, %s1129_s27  ;;  %s22_s23 = int_to_ptr.vmem [resolvable:$true] %s21_s23 }
  0x27   :  { %p1133_p3 = scmp.lt.u32.totalorder %s1129_s27, %s1437_s0 }
  0x29   :  { %p1135_p4 = pnand %p1133_p3, %p1130_p2 }
  0x2b   :  { %1138 = shalt.err (!%p1135_p4)
}
  0x2c   :  { %s1139_s8 = scalar_lea.vmem %s22_s23, 512  ;;  %p1144_p6 = scmp.lt.s32.totalorder %s22_s23, %s22_s23 }
  0x2d   :  { %p1140_p5 = scmp.ne.s32.totalorder %s22_s23, %s1139_s8  ;;  %p1145_p7 = scmp.lt.s32.totalorder %s1139_s8, %s1139_s8 }
  0x2f   :  { %p1146_p8 = por %p1145_p7, %p1144_p6 }
  0x31   :  { %p1147_p9 = pnand %p1146_p8, %p1140_p5 }
  0x33   :  { %1150 = shalt.err (!%p1147_p9)
}
  0x34   :  { %s1254_s3 = smov 128   ;;  %s1255_s24 = smov 8  }
  0x35   :  { %27 = dma.hbm_to_vmem [thread:$0]  %s1437_s0, 512, %s22_s23, [#allocation3], %s1254_s3, %s1254_s3, %s1255_s24  }
  0x36   :  { %s1256_s11 = smov [#allocation7]   ;;  %s1257_s13 = smov [#allocation10]  }
  0x37   :  { %s44_s12 = sshll.u32 %s1256_s11, 4  ;;  %s65_s14 = sshll.u32 %s1257_s13, 4  ;;  %s45_s12 = int_to_ptr.vmem [resolvable:$true] %s44_s12  ;;  %s66_s14 = int_to_ptr.vmem [resolvable:$true] %s65_s14 }
  0x38   :  { %s1151_s17 = scalar_lea.hbm %s1439_s2, 128 }
  0x39   :  { %p1152_p10 = scmp.ne.s32.totalorder %s1439_s2, %s1151_s17  ;;  %p1155_p11 = scmp.lt.u32.totalorder %s1151_s17, %s1439_s2 }
  0x3b   :  { %p1157_p12 = pnand %p1155_p11, %p1152_p10 }
  0x3d   :  { %1160 = shalt.err (!%p1157_p12)
}
  0x3e   :  { %s1161_s0 = scalar_lea.vmem %s45_s12, 128  ;;  %p1166_p0 = scmp.lt.s32.totalorder %s45_s12, %s45_s12 }
  0x3f   :  { %p1162_p13 = scmp.ne.s32.totalorder %s45_s12, %s1161_s0  ;;  %p1167_p1 = scmp.lt.s32.totalorder %s1161_s0, %s1161_s0 }
  0x41   :  { %p1168_p2 = por %p1167_p1, %p1166_p0 }
  0x43   :  { %p1169_p3 = pnand %p1168_p2, %p1162_p13 }
  0x45   :  { %1172 = shalt.err (!%p1169_p3)
}
  0x46   :  { %47 = dma.hbm_to_vmem [thread:$0]  %s1439_s2, 128, %s45_s12, [#allocation6]  }
  0x47   :  { %s1173_s28 = scalar_lea.hbm %s1441_s4, 3072 }
  0x48   :  { %p1174_p4 = scmp.ne.s32.totalorder %s1441_s4, %s1173_s28  ;;  %p1177_p5 = scmp.lt.u32.totalorder %s1173_s28, %s1441_s4 }
  0x4a   :  { %p1179_p6 = pnand %p1177_p5, %p1174_p4 }
  0x4c   :  { %1182 = shalt.err (!%p1179_p6)
}
  0x4d   :  { %s1183_s9 = scalar_lea.vmem %s66_s14, 3072  ;;  %p1188_p8 = scmp.lt.s32.totalorder %s66_s14, %s66_s14 }
  0x4e   :  { %p1184_p7 = scmp.ne.s32.totalorder %s66_s14, %s1183_s9  ;;  %p1189_p9 = scmp.lt.s32.totalorder %s1183_s9, %s1183_s9 }
  0x50   :  { %p1190_p10 = por %p1189_p9, %p1188_p8 }
  0x52   :  { %p1191_p11 = pnand %p1190_p10, %p1184_p7 }
  0x54   :  { %1194 = shalt.err (!%p1191_p11)
}
  0x55   :  { %71 = dma.hbm_to_vmem [thread:$0]  %s1441_s4, 3072, %s66_s14, [#allocation9], %s1251_s1, %s1251_s1, %s1252_s19  }
  0x56   :  { %s1258_s11 = smov [#allocation11]   ;;  %s1195_s16 = scalar_lea.hbm %s1442_s5, 1024 }
  0x57   :  { %s77_s12 = sshll.u32 %s1258_s11, 4  ;;  %p1196_p12 = scmp.ne.s32.totalorder %s1442_s5, %s1195_s16  ;;  %s78_s12 = int_to_ptr.vmem [resolvable:$true] %s77_s12 }
  0x58   :  { %p1199_p13 = scmp.lt.u32.totalorder %s1195_s16, %s1442_s5 }
  0x5a   :  { %p1201_p0 = pnand %p1199_p13, %p1196_p12 }
  0x5c   :  { %1204 = shalt.err (!%p1201_p0)
}
  0x5d   :  { %s1205_s22 = scalar_lea.vmem %s78_s12, 1024  ;;  %p1210_p2 = scmp.lt.s32.totalorder %s78_s12, %s78_s12 }
  0x5e   :  { %p1206_p1 = scmp.ne.s32.totalorder %s78_s12, %s1205_s22  ;;  %p1211_p3 = scmp.lt.s32.totalorder %s1205_s22, %s1205_s22 }
  0x60   :  { %p1212_p4 = por %p1211_p3, %p1210_p2 }
  0x62   :  { %p1213_p5 = pnand %p1212_p4, %p1206_p1 }
  0x64   :  { %1216 = shalt.err (!%p1213_p5)
}
  0x65   :  { %83 = dma.hbm_to_vmem [thread:$0]  %s1442_s5, 1024, %s78_s12, [#allocation12], %s1251_s1, %s1251_s1, %s1252_s19  }
  0x66   :  { %1239 = dma.done.wait [#allocation3], 512  }
  0x67   :  { %1240 = vsyncadd [#allocation3], 4294966784 }
  0x68   :  { %1241 = dma.done.wait [#allocation6], 192  }
  0x69   :  { %1242 = vsyncadd [#allocation6], 4294967104 }
  0x6a   :  { %1243 = dma.done.wait [#allocation9], 4096  }
  0x6b   :  { %1244 = vsyncadd [#allocation9], 4294963200 }
  0x6c   :  { %1245 = dma.done.wait [#allocation12], 1024  }
  0x6d   :  { %1246 = vsyncadd [#allocation12], 4294966272  ;;  %v1039_v0 = vld [vmem:[#allocation8] sm:$0xff]   ;;  %v1040_v1 = vld [vmem:[#allocation8 + $0x8] sm:$0xff]   ;;  %v148_v40 = vlaneseq  ;;  %vm349_vm0 = vcmask 1040384   ;;  %vm359_vm2 = vcmask 1046528  }
  0x6e   :  { %968 = vmatprep.subr.bf16.mxu0 %v1039_v0  ;;  %v1041_v2 = vld [vmem:[#allocation8 + $0x10] sm:$0xff]   ;;  %v1042_v3 = vld [vmem:[#allocation8 + $0x18] sm:$0xff]   ;;  %v1390_v6 = vld [vmem:[#allocation2 + $0x10] sm:$0xff]  ;;  %s1259_s5 = smov [#allocation13]  }
  0x6f   :  { %969 = vmatpush3.bf16.msra.mxu0 %v1039_v0  ;;  %v1386_v4 = vld [vmem:[#allocation2] sm:$0xff]  ;;  %v1388_v5 = vld [vmem:[#allocation2 + $0x8] sm:$0xff]  ;;  %v1392_v7 = vld [vmem:[#allocation2 + $0x18] sm:$0xff]  ;;  %v128_v12 = vmul.f32 %v1390_v6, %v1390_v6  ;;  %v149_v41 = vshrl.u32 %v148_v40, 7  ;;  %s846_s1 = sshll.u32 %s1259_s5, 4  ;;  %s847_s1 = int_to_ptr.vmem [resolvable:$true] %s846_s1 }
  0x70   :  { %970 = vmatprep.subr.bf16.mxu0 %v1040_v1  ;;  %v126_v8 = vmul.f32 %v1386_v4, %v1386_v4  ;;  %v1043_v9 = vld [vmem:[#allocation8 + $0x20] sm:$0xff]   ;;  %v116_v10 = vadd.f32 %v1388_v5, %v1386_v4  ;;  %v127_v11 = vmul.f32 %v1388_v5, %v1388_v5  ;;  %v129_v14 = vmul.f32 %v1392_v7, %v1392_v7  ;;  %v1044_v18 = vld [vmem:[#allocation8 + $0x28] sm:$0xff]   ;;  %v1045_v23 = vld [vmem:[#allocation8 + $0x30] sm:$0xff]   ;;  %s1217_s19 = scalar_lea.vmem %s847_s1, 512  ;;  %p1222_p7 = scmp.lt.s32.totalorder %s847_s1, %s847_s1 }
  0x71   :  { %v1046_v28 = vld [vmem:[#allocation8 + $0x38] sm:$0xff]   ;;  %v103_v42 = vld [vmem:[#allocation5] sm:$0x1]  ;;  %v1406_v43 = vsub.s32 0, %v149_v41  ;;  %v104_v46 = vld [vmem:[#allocation5 + $0x1] sm:$0x1]  ;;  %p1218_p6 = scmp.ne.s32.totalorder %s847_s1, %s1217_s19  ;;  %p1223_p8 = scmp.lt.s32.totalorder %s1217_s19, %s1217_s19 }
  0x72   :  { %v117_v13 = vadd.f32 %v116_v10, %v1390_v6  ;;  %v130_v15 = vadd.f32 %v127_v11, %v126_v8  ;;  %v1050_v8 = vld [vmem:[#allocation10 + $0x48] sm:$0xff]   ;;  %v1053_v11 = vld [vmem:[#allocation10 + $0x50] sm:$0xff]   ;;  %vm895_vm1 = vmneg %vm349_vm0 }
  0x73   :  { %971 = vmatpush3.bf16.msra.mxu0 %v1040_v1  ;;  %v1047_v1 = vld [vmem:[#allocation10 + $0x40] sm:$0xff]   ;;  %v1052_v10 = vld [vmem:[#allocation10 + $0x88] sm:$0xff]   ;;  %p1224_p9 = por %p1223_p8, %p1222_p7 }
  0x74   :  { %972 = vmatprep.subr.bf16.mxu0 %v1041_v2  ;;  %v118_v16 = vadd.f32 %v117_v13, %v1392_v7  ;;  %v131_v17 = vadd.f32 %v130_v15, %v128_v12  ;;  %920 = vmatprep.subr.bf16.mxu1 %v1047_v1  ;;  %v1054_v12 = vld [vmem:[#allocation10 + $0x10] sm:$0xff]   ;;  %v1057_v15 = vld [vmem:[#allocation10 + $0x18] sm:$0xff]  }
  0x75   :  { %v1055_v13 = vld [vmem:[#allocation10 + $0x90] sm:$0xff]   ;;  %p1225_p10 = pnand %p1224_p9, %p1218_p6 }
  0x76   :  { %v119_v19 = vrot.slane %v118_v16, 4  ;;  %v132_v20 = vadd.f32 %v131_v17, %v129_v14  ;;  %v1056_v14 = vld [vmem:[#allocation10 + $0x58] sm:$0xff]   ;;  %v1059_v17 = vld [vmem:[#allocation10 + $0x60] sm:$0xff]  }
  0x77   :  { %973 = vmatpush3.bf16.msra.mxu0 %v1041_v2  ;;  %v1048_v2 = vld [vmem:[#allocation10] sm:$0xff]  }
  0x78   :  { %974 = vmatprep.subr.bf16.mxu0 %v1042_v3  ;;  %v120_v21 = vadd.f32 %v119_v19, %v118_v16  ;;  %v133_v22 = vrot.slane %v132_v20, 4  ;;  %921 = vmatpush3.bf16.msra.mxu1 %v1048_v2  ;;  %v1058_v16 = vld [vmem:[#allocation10 + $0x98] sm:$0xff]   ;;  %v1061_v19 = vld [vmem:[#allocation10 + $0xa0] sm:$0xff]  }
  0x79   :  { %922 = vmatprep.subr.bf16.mxu1 %v1050_v8 }
  0x7a   :  { %v121_v24 = vrot.slane %v120_v21, 2  ;;  %v134_v25 = vadd.f32 %v133_v22, %v132_v20  ;;  %v1062_v20 = vld [vmem:[#allocation10 + $0x68] sm:$0xff]  }
  0x7b   :  { %975 = vmatpush3.bf16.msra.mxu0 %v1042_v3  ;;  %v1049_v3 = vld [vmem:[#allocation10 + $0x80] sm:$0xff]   ;;  %v1064_v22 = vld [vmem:[#allocation10 + $0xa8] sm:$0xff]  }
  0x7c   :  { %976 = vmatprep.subr.bf16.mxu0 %v1043_v9  ;;  %v122_v26 = vadd.f32 %v121_v24, %v120_v21  ;;  %v135_v27 = vrot.slane %v134_v25, 2  ;;  %v1063_v21 = vld [vmem:[#allocation10 + $0x28] sm:$0xff]   ;;  %v1067_v24 = vld [vmem:[#allocation10 + $0xb0] sm:$0xff]  }
  0x7e   :  { %v123_v29 = vrot.slane %v122_v26, 1  ;;  %v136_v30 = vadd.f32 %v135_v27, %v134_v25  ;;  %v1066_v25 = vld [vmem:[#allocation10 + $0x30] sm:$0xff]   ;;  %v1070_v27 = vld [vmem:[#allocation10 + $0xb8] sm:$0xff]  }
  0x7f   :  { %977 = vmatpush3.bf16.msra.mxu0 %v1043_v9  ;;  %v1051_v9 = vld [vmem:[#allocation10 + $0x8] sm:$0xff]  }
  0x80   :  { %978 = vmatprep.subr.bf16.mxu0 %v1044_v18  ;;  %v124_v31 = vadd.f32 %v123_v29, %v122_v26  ;;  %v137_v32 = vrot.slane %v136_v30, 1  ;;  %923 = vmatpush3.bf16.msra.mxu1 %v1051_v9  ;;  %v1068_v26 = vld [vmem:[#allocation10 + $0x78] sm:$0xff]  }
  0x81   :  { %924 = vmatprep.subr.bf16.mxu1 %v1053_v11  ;;  %v861_v29 = vld [vmem:[#allocation7] ss:$0 sm:$0xff] }
  0x82   :  { %v138_v33 = vadd.f32 %v137_v32, %v136_v30  ;;  %v140_v34 = vmul.f32 0.03125, %v124_v31 }
  0x83   :  { %979 = vmatpush3.bf16.msra.mxu0 %v1044_v18  ;;  %v1060_v18 = vld [vmem:[#allocation10 + $0x20] sm:$0xff]  }
  0x84   :  { %980 = vmatprep.subr.bf16.mxu0 %v1045_v23  ;;  %v141_v35 = vmul.f32 0.03125, %v138_v33  ;;  %v142_v36 = vmul.f32 %v140_v34, %v140_v34  ;;  %925 = vmatpush3.bf16.msra.mxu1 %v1054_v12 }
  0x85   :  { %926 = vmatprep.subr.bf16.mxu1 %v1056_v14 }
  0x86   :  { %v143_v37 = vsub.f32 %v141_v35, %v142_v36 }
  0x87   :  { %981 = vmatpush3.bf16.msra.mxu0 %v1045_v23  ;;  %v1065_v23 = vld [vmem:[#allocation10 + $0x70] sm:$0xff]  }
  0x88   :  { %982 = vmatprep.subr.bf16.mxu0 %v1046_v28  ;;  %v144_v38 = vmax.f32 %v143_v37, 0.0  ;;  %927 = vmatpush3.bf16.msra.mxu1 %v1057_v15 }
  0x89   :  { %928 = vmatprep.subr.bf16.mxu1 %v1059_v17 }
  0x8a   :  { %v145_v39 = vadd.f32 1e-05, %v144_v38 }
  0x8b   :  { %983 = vmatpush3.bf16.msra.mxu0 %v1046_v28  ;;  %v1069_v28 = vld [vmem:[#allocation10 + $0x38] sm:$0xff]  }
  0x8c   :  { %1079 = vrsqrt.f32 %v145_v39  ;;  %988 = vmatprep.subr.bf16.mxu0 %v1049_v3  ;;  %929 = vmatpush3.bf16.msra.mxu1 %v1060_v18 }
  0x8d   :  { %930 = vmatprep.subr.bf16.mxu1 %v1062_v20 }
  0x90   :  { %931 = vmatpush3.bf16.msra.mxu1 %v1063_v21 }
  0x91   :  { %932 = vmatprep.subr.bf16.mxu1 %v1065_v23 }
  0x94   :  { %933 = vmatpush3.bf16.msra.mxu1 %v1066_v25 }
  0x95   :  { %934 = vmatprep.subr.bf16.mxu1 %v1068_v26 }
  0x96   :  { %v1080_v44 = vpop.eup %1079 }
  0x97   :  { %v147_v45 = vmul.f32 %v1080_v44, %v103_v42 }
  0x98   :  { %935 = vmatpush3.bf16.msra.mxu1 %v1069_v28 }
  0x99   :  { %v151_v47 = vrot.slane %v147_v45, %v1406_v43  ;;  %v156_v48 = vmul.f32 %v147_v45, %v140_v34 }
  0x9b   :  { %v152_v49 = vmul.f32 %v151_v47, %v1386_v4  ;;  %v153_v50 = vmul.f32 %v151_v47, %v1388_v5  ;;  %v157_v51 = vsub.f32 %v104_v46, %v156_v48  ;;  %v154_v52 = vmul.f32 %v151_v47, %v1390_v6 }
  0x9c   :  { %v155_v53 = vmul.f32 %v151_v47, %v1392_v7 }
  0x9d   :  { %v161_v54 = vrot.slane %v157_v51, %v1406_v43 }
  0x9f   :  { %v162_v55 = vadd.f32 %v161_v54, %v152_v49  ;;  %v163_v56 = vadd.f32 %v161_v54, %v153_v50  ;;  %v164_v57 = vadd.f32 %v161_v54, %v154_v52  ;;  %v165_v58 = vadd.f32 %v161_v54, %v155_v53 }
  0xa1   :  { %v166_v59 = vmax.f32 %v162_v55, 0.0  ;;  %v167_v60 = vmax.f32 %v163_v56, 0.0  ;;  %v168_v61 = vmax.f32 %v164_v57, 0.0  ;;  %v169_v62 = vmax.f32 %v165_v58, 0.0 }
  0xa3   :  { %v170_v63 = vpack.c.bf16 %v167_v60, %v166_v59  ;;  %v171_v0 = vpack.c.bf16 %v169_v62, %v168_v61 }
  0xa5   :  { %984 = vmatprep.mubr.bf16.mxu0 %v170_v63 }
  0xa6   :  { %985 = vmatmul.mubr.bf16.vlgmr.msra.gmra.mrb[0].mxu0 %v171_v0 }
  0xa7   :  { %989 = vmatpush3.bf16.msra.mxu0 %v1049_v3  ;;  %v107_v3 = vld [vmem:[#allocation7 + $0x1] sm:$0x1] }
  0xa8   :  { %990 = vmatprep.subr.bf16.mxu0 %v1052_v10 }
  0xab   :  { %991 = vmatpush3.bf16.msra.mxu0 %v1052_v10  ;;  %v108_v10 = vld [vmem:[#allocation7 + $0x2] sm:$0x1] }
  0xac   :  { %992 = vmatprep.subr.bf16.mxu0 %v1055_v13 }
  0xaf   :  { %993 = vmatpush3.bf16.msra.mxu0 %v1055_v13 }
  0xb0   :  { %994 = vmatprep.subr.bf16.mxu0 %v1058_v16 }
  0xb3   :  { %995 = vmatpush3.bf16.msra.mxu0 %v1058_v16 }
  0xb4   :  { %996 = vmatprep.subr.bf16.mxu0 %v1061_v19 }
  0xb7   :  { %997 = vmatpush3.bf16.msra.mxu0 %v1061_v19 }
  0xb8   :  { %998 = vmatprep.subr.bf16.mxu0 %v1064_v22 }
  0xbb   :  { %999 = vmatpush3.bf16.msra.mxu0 %v1064_v22 }
  0xbc   :  { %1000 = vmatprep.subr.bf16.mxu0 %v1067_v24 }
  0xbf   :  { %1001 = vmatpush3.bf16.msra.mxu0 %v1067_v24 }
  0xc0   :  { %1002 = vmatprep.subr.bf16.mxu0 %v1070_v27 }
  0xc3   :  { %1003 = vmatpush3.bf16.msra.mxu0 %v1070_v27 }
 0x179   :  { %v986_v30 = vpop.f32.mrb[0].mxu0 }
 0x17a   :  { %v274_v31 = vpop.f32.mrb[1].mxu0  ;;  %v283_v35 = vadd.f32 %v986_v30, %v861_v29 }
 0x17b   :  { %v275_v32 = vadd.f32 %v861_v29, %v274_v31  ;;  %v987_v33 = vpop.f32.mrb[2].mxu0 }
 0x17c   :  { %v277_v34 = vpop.f32.mrb[3].mxu0  ;;  %v286_v38 = vadd.f32 %v987_v33, %v861_v29  ;;  %v301_v41 = vmul.f32 %v283_v35, %v283_v35  ;;  %v1071_v33 = vld [vmem:[#allocation11] sm:$0xff]  }
 0x17d   :  { %v278_v36 = vadd.f32 %v861_v29, %v277_v34  ;;  %v299_v37 = vmul.f32 %v275_v32, %v275_v32  ;;  %1008 = vmatprep.subr.bf16.mxu1 %v1071_v33  ;;  %v1072_v34 = vld [vmem:[#allocation11 + $0x8] sm:$0xff]  }
 0x17e   :  { %v302_v45 = vmul.f32 %v286_v38, %v286_v38 }
 0x17f   :  { %v289_v39 = vadd.f32 %v278_v36, %v275_v32  ;;  %v300_v40 = vmul.f32 %v278_v36, %v278_v36 }
 0x181   :  { %v290_v42 = vadd.f32 %v289_v39, %v283_v35  ;;  %v303_v44 = vadd.f32 %v300_v40, %v299_v37  ;;  %v1075_v37 = vld [vmem:[#allocation11 + $0x20] sm:$0xff]   ;;  %v1077_v39 = vld [vmem:[#allocation11 + $0x30] sm:$0xff]   ;;  %v1078_v40 = vld [vmem:[#allocation11 + $0x38] sm:$0xff]  }
 0x183   :  { %v291_v46 = vadd.f32 %v290_v42, %v286_v38  ;;  %v304_v47 = vadd.f32 %v303_v44, %v301_v41 }
 0x185   :  { %v292_v48 = vrot.slane %v291_v46, 4  ;;  %v305_v49 = vadd.f32 %v304_v47, %v302_v45  ;;  %v870_v45 = vld [vmem:[#allocation7 + $0x3] ss:$0 sm:$0xff] }
 0x187   :  { %v293_v50 = vadd.f32 %v292_v48, %v291_v46  ;;  %v306_v51 = vrot.slane %v305_v49, 4 }
 0x189   :  { %v294_v52 = vrot.slane %v293_v50, 2  ;;  %v307_v53 = vadd.f32 %v306_v51, %v305_v49 }
 0x18b   :  { %v295_v54 = vadd.f32 %v294_v52, %v293_v50  ;;  %v308_v55 = vrot.slane %v307_v53, 2 }
 0x18d   :  { %v296_v56 = vrot.slane %v295_v54, 1  ;;  %v309_v57 = vadd.f32 %v308_v55, %v307_v53 }
 0x18f   :  { %v297_v58 = vadd.f32 %v296_v56, %v295_v54  ;;  %v310_v59 = vrot.slane %v309_v57, 1 }
 0x191   :  { %v311_v60 = vadd.f32 %v310_v59, %v309_v57  ;;  %v313_v61 = vmul.f32 0.03125, %v297_v58 }
 0x193   :  { %v314_v62 = vmul.f32 0.03125, %v311_v60  ;;  %v315_v63 = vmul.f32 %v313_v61, %v313_v61 }
 0x195   :  { %v316_v0 = vsub.f32 %v314_v62, %v315_v63 }
 0x197   :  { %v317_v1 = vmax.f32 %v316_v0, 0.0 }
 0x199   :  { %v318_v2 = vadd.f32 1e-05, %v317_v1 }
 0x19b   :  { %1081 = vrsqrt.f32 %v318_v2 }
 0x1a5   :  { %v1082_v8 = vpop.eup %1081 }
 0x1a6   :  { %v320_v9 = vmul.f32 %v1082_v8, %v107_v3 }
 0x1a8   :  { %v324_v11 = vrot.slane %v320_v9, %v1406_v43  ;;  %v329_v12 = vmul.f32 %v320_v9, %v313_v61 }
 0x1aa   :  { %v326_v13 = vmul.f32 %v324_v11, %v278_v36  ;;  %v325_v14 = vmul.f32 %v324_v11, %v275_v32  ;;  %v330_v15 = vsub.f32 %v108_v10, %v329_v12  ;;  %v327_v16 = vmul.f32 %v324_v11, %v283_v35  ;;  %v1073_v35 = vld [vmem:[#allocation11 + $0x10] sm:$0xff]   ;;  %v1074_v36 = vld [vmem:[#allocation11 + $0x18] sm:$0xff]  }
 0x1ab   :  { %v328_v17 = vmul.f32 %v324_v11, %v286_v38  ;;  %v1076_v38 = vld [vmem:[#allocation11 + $0x28] sm:$0xff]  }
 0x1ac   :  { %v334_v18 = vrot.slane %v330_v15, %v1406_v43 }
 0x1ae   :  { %v335_v19 = vadd.f32 %v334_v18, %v325_v14  ;;  %v336_v20 = vadd.f32 %v334_v18, %v326_v13  ;;  %v337_v21 = vadd.f32 %v334_v18, %v327_v16  ;;  %v338_v22 = vadd.f32 %v334_v18, %v328_v17 }
 0x1b0   :  { %v339_v23 = vmax.f32 %v335_v19, 0.0  ;;  %v340_v24 = vmax.f32 %v336_v20, 0.0  ;;  %v341_v25 = vmax.f32 %v337_v21, 0.0  ;;  %v342_v26 = vmax.f32 %v338_v22, 0.0 }
 0x1b2   :  { %v343_v27 = vpack.c.bf16 %v340_v24, %v339_v23  ;;  %v344_v28 = vpack.c.bf16 %v342_v26, %v341_v25 }
 0x1b4   :  { %594 = vmatprep.mubr.bf16.mxu1 %v343_v27  ;;  %v347_v29 = vrot.slane %v343_v27, 7  ;;  %v357_v30 = vrot.slane %v343_v27, 1  ;;  %v358_v31 = vrot.slane %v344_v28, 1  ;;  %v348_v32 = vrot.slane %v344_v28, 7 }
 0x1b6   :  { %896 = vmatmul.mubr.msk.bf16.vlgmr.msra.gmra.mrb[0].mxu1 %vm895_vm1, %v347_v29  ;;  %1004 = vmatprep.mubr.msk.bf16.mxu0 %vm359_vm2, %v357_v30 }
 0x1b7   :  { %602 = vmatprep.mubr.bf16.mxu1 %v344_v28  ;;  %1005 = vmatmul.mubr.msk.bf16.vlgmr.msra.gmra.mrb[4].mxu0 %vm359_vm2, %v358_v31 }
 0x1b8   :  { %1009 = vmatpush3.bf16.msra.mxu1 %v1071_v33 }
 0x1b9   :  { %1010 = vmatprep.subr.bf16.mxu1 %v1072_v34 }
 0x1bc   :  { %1011 = vmatpush3.bf16.msra.mxu1 %v1072_v34 }
 0x1bd   :  { %1012 = vmatprep.subr.bf16.mxu1 %v1073_v35 }
 0x1be   :  { %898 = vmatmul.mubr.msk.bf16.gmra.mrb[4].mxu1 %vm895_vm1, %v348_v32 }
 0x1c0   :  { %1013 = vmatpush3.bf16.msra.mxu1 %v1073_v35  ;;  %v110_v35 = vld [vmem:[#allocation7 + $0x4] sm:$0x1] }
 0x1c1   :  { %1014 = vmatprep.subr.bf16.mxu1 %v1074_v36 }
 0x1c4   :  { %1015 = vmatpush3.bf16.msra.mxu1 %v1074_v36 }
 0x1c5   :  { %1016 = vmatprep.subr.bf16.mxu1 %v1075_v37 }
 0x1c8   :  { %1017 = vmatpush3.bf16.msra.mxu1 %v1075_v37 }
 0x1c9   :  { %1018 = vmatprep.subr.bf16.mxu1 %v1076_v38 }
 0x1cc   :  { %1019 = vmatpush3.bf16.msra.mxu1 %v1076_v38  ;;  %v111_v38 = vld [vmem:[#allocation7 + $0x5] sm:$0x1] }
 0x1cd   :  { %1020 = vmatprep.subr.bf16.mxu1 %v1077_v39 }
 0x1d0   :  { %1021 = vmatpush3.bf16.msra.mxu1 %v1077_v39 }
 0x1d1   :  { %1022 = vmatprep.subr.bf16.mxu1 %v1078_v40 }
 0x1d4   :  { %1023 = vmatpush3.bf16.msra.mxu1 %v1078_v40 }
 0x289   :  { %v936_v41 = vpop.f32.mrb[0].mxu1 }
 0x28a   :  { %v937_v42 = vpop.f32.mrb[1].mxu1  ;;  %v1006_v44 = vpop.f32.mrb[4].mxu0 }
 0x28b   :  { %v938_v46 = vadd.f32 %v937_v42, %v936_v41  ;;  %v939_v47 = vpop.f32.mrb[2].mxu1  ;;  %v645_v48 = vpop.f32.mrb[5].mxu0 }
 0x28c   :  { %v940_v49 = vpop.f32.mrb[3].mxu1  ;;  %v1007_v50 = vpop.f32.mrb[6].mxu0 }
 0x28d   :  { %v597_v51 = vadd.f32 %v938_v46, %v870_v45  ;;  %v941_v52 = vadd.f32 %v940_v49, %v939_v47  ;;  %v648_v53 = vpop.f32.mrb[7].mxu0 }
 0x28f   :  { %v646_v54 = vadd.f32 %v645_v48, %v597_v51  ;;  %v600_v55 = vadd.f32 %v941_v52, %v870_v45 }
 0x291   :  { %v649_v56 = vadd.f32 %v648_v53, %v600_v55  ;;  %v942_v57 = vpop.f32.mrb[4].mxu1  ;;  %v670_v59 = vmul.f32 %v646_v54, %v646_v54 }
 0x292   :  { %v943_v58 = vpop.f32.mrb[5].mxu1 }
 0x293   :  { %v660_v60 = vadd.f32 %v649_v56, %v646_v54  ;;  %v671_v61 = vmul.f32 %v649_v56, %v649_v56  ;;  %v944_v62 = vadd.f32 %v943_v58, %v942_v57  ;;  %v945_v63 = vpop.f32.mrb[6].mxu1 }
 0x294   :  { %v946_v0 = vpop.f32.mrb[7].mxu1 }
 0x295   :  { %v674_v1 = vadd.f32 %v671_v61, %v670_v59  ;;  %v605_v2 = vadd.f32 %v944_v62, %v870_v45  ;;  %v947_v3 = vadd.f32 %v946_v0, %v945_v63 }
 0x297   :  { %v654_v8 = vadd.f32 %v1006_v44, %v605_v2  ;;  %v608_v9 = vadd.f32 %v947_v3, %v870_v45 }
 0x299   :  { %v661_v10 = vadd.f32 %v660_v60, %v654_v8  ;;  %v672_v11 = vmul.f32 %v654_v8, %v654_v8  ;;  %v657_v12 = vadd.f32 %v1007_v50, %v608_v9  ;;  %v901_v60 = vld [vmem:[#allocation5 + $0x2] ss:$0 sm:$0xff] }
 0x29b   :  { %v675_v13 = vadd.f32 %v674_v1, %v672_v11  ;;  %v662_v14 = vadd.f32 %v661_v10, %v657_v12  ;;  %v673_v15 = vmul.f32 %v657_v12, %v657_v12 }
 0x29d   :  { %v663_v16 = vrot.slane %v662_v14, 4  ;;  %v676_v17 = vadd.f32 %v675_v13, %v673_v15 }
 0x29f   :  { %v664_v18 = vadd.f32 %v663_v16, %v662_v14  ;;  %v677_v19 = vrot.slane %v676_v17, 4 }
 0x2a1   :  { %v665_v20 = vrot.slane %v664_v18, 2  ;;  %v678_v21 = vadd.f32 %v677_v19, %v676_v17 }
 0x2a3   :  { %v666_v22 = vadd.f32 %v665_v20, %v664_v18  ;;  %v679_v23 = vrot.slane %v678_v21, 2 }
 0x2a5   :  { %v667_v24 = vrot.slane %v666_v22, 1  ;;  %v680_v25 = vadd.f32 %v679_v23, %v678_v21 }
 0x2a7   :  { %v668_v26 = vadd.f32 %v667_v24, %v666_v22  ;;  %v681_v27 = vrot.slane %v680_v25, 1 }
 0x2a9   :  { %v682_v28 = vadd.f32 %v681_v27, %v680_v25  ;;  %v684_v29 = vmul.f32 0.03125, %v668_v26 }
 0x2ab   :  { %v685_v30 = vmul.f32 0.03125, %v682_v28  ;;  %v686_v31 = vmul.f32 %v684_v29, %v684_v29 }
 0x2ad   :  { %v687_v32 = vsub.f32 %v685_v30, %v686_v31 }
 0x2af   :  { %v688_v33 = vmax.f32 %v687_v32, 0.0 }
 0x2b1   :  { %v689_v34 = vadd.f32 1e-05, %v688_v33 }
 0x2b3   :  { %1083 = vrsqrt.f32 %v689_v34 }
 0x2bd   :  { %v1084_v36 = vpop.eup %1083 }
 0x2be   :  { %v691_v37 = vmul.f32 %v1084_v36, %v110_v35 }
 0x2c0   :  { %v695_v39 = vrot.slane %v691_v37, %v1406_v43  ;;  %v700_v40 = vmul.f32 %v691_v37, %v684_v29 }
 0x2c2   :  { %v699_v41 = vmul.f32 %v695_v39, %v657_v12  ;;  %v701_v42 = vsub.f32 %v111_v38, %v700_v40  ;;  %v696_v44 = vmul.f32 %v695_v39, %v646_v54  ;;  %v697_v45 = vmul.f32 %v695_v39, %v649_v56 }
 0x2c3   :  { %v698_v46 = vmul.f32 %v695_v39, %v654_v8 }
 0x2c4   :  { %v705_v47 = vrot.slane %v701_v42, %v1406_v43 }
 0x2c6   :  { %v709_v48 = vadd.f32 %v705_v47, %v699_v41  ;;  %v706_v49 = vadd.f32 %v705_v47, %v696_v44  ;;  %v707_v50 = vadd.f32 %v705_v47, %v697_v45  ;;  %v708_v51 = vadd.f32 %v705_v47, %v698_v46 }
 0x2c8   :  { %v713_v52 = vmax.f32 %v709_v48, 0.0  ;;  %v710_v53 = vmax.f32 %v706_v49, 0.0  ;;  %v711_v55 = vmax.f32 %v707_v50, 0.0  ;;  %v712_v57 = vmax.f32 %v708_v51, 0.0 }
 0x2ca   :  { %v714_v58 = vpack.c.bf16 %v711_v55, %v710_v53  ;;  %v715_v59 = vpack.c.bf16 %v713_v52, %v712_v57 }
 0x2cc   :  { %1024 = vmatprep.mubr.bf16.mxu1 %v714_v58 }
 0x2cd   :  { %1025 = vmatmul.mubr.bf16.vlgmr.msra.gmra.mrb[8].mxu1 %v715_v59 }
 0x3a0   :  { %v1026_v61 = vpop.f32.mrb[8].mxu1 }
 0x3a1   :  { %v827_v62 = vadd.f32 %v1026_v61, %v901_v60  ;;  %v818_v54 = vpop.f32.mrb[9].mxu1 }
 0x3a2   :  { %v819_v56 = vadd.f32 %v901_v60, %v818_v54  ;;  %v1027_v63 = vpop.f32.mrb[10].mxu1 }
 0x3a3   :  { %v835_v43 = vadd.f32 %v827_v62, %v1390_v6  ;;  %v830_v0 = vadd.f32 %v1027_v63, %v901_v60  ;;  %v821_v1 = vpop.f32.mrb[11].mxu1 }
 0x3a4   :  { %v833_v2 = vadd.f32 %v819_v56, %v1386_v4  ;;  %v822_v3 = vadd.f32 %v901_v60, %v821_v1 }
 0x3a5   :  { %839 = vst [vmem:[#allocation13 + $0x10] sm:$0xff] %v835_v43  ;;  %v836_v8 = vadd.f32 %v830_v0, %v1392_v7 }
 0x3a6   :  { %837 = vst [vmem:[#allocation13] sm:$0xff] %v833_v2  ;;  %v834_v9 = vadd.f32 %v822_v3, %v1388_v5 }
 0x3a7   :  { %840 = vst [vmem:[#allocation13 + $0x18] sm:$0xff] %v836_v8 }
 0x3a8   :  { %838 = vst [vmem:[#allocation13 + $0x8] sm:$0xff] %v834_v9 }
 0x3a9   :  { %1228 = shalt.err (!%p1225_p10)
}
 0x3aa   :  { %s1229_s25 = scalar_lea.hbm %s1443_s6, 512 }
 0x3ab   :  { %p1230_p11 = scmp.ne.s32.totalorder %s1443_s6, %s1229_s25  ;;  %p1233_p12 = scmp.lt.u32.totalorder %s1229_s25, %s1443_s6 }
 0x3ad   :  { %p1235_p13 = pnand %p1233_p12, %p1230_p11 }
 0x3af   :  { %1238 = shalt.err (!%p1235_p13)
}
 0x3b0   :  { %852 = dma.vmem_to_hbm [thread:$0]  %s847_s1, 512, %s1443_s6, [#allocation4], %s1254_s3, %s1254_s3, %s1255_s24  }
 0x3b1   :  { %1247 = dma.done.wait [#allocation4], 512  }
 0x3b2   :  { %1248 = vsyncadd [#allocation4], 4294966784 }
 0x3b3   :  { %856 = vsyncpa [#allocation3], 1 }
 0x3b4   :  { %857 = vsyncpa [#allocation6], 1 }
 0x3b5   :  { %858 = vsyncpa [#allocation9], 1 }
 0x3b6   :  { %859 = vsyncpa [#allocation12], 1 }
 0x3b7   :  { %860 = vsyncpa [#allocation4], 1 }

</bundles_post_ra>
